<compile_context>
chip_gen: v5e
topology: v5e:2x2
jax: 0.10.0
libtpu: 0.0.40
codegen_flags: <defaults>
</compile_context>

<pallas_src>
import jax
import jax.numpy as jnp
from jax.experimental import pallas as pl
from jax.experimental.pallas import tpu as pltpu


def _logreg_kernel(x_ref, w_ref, b_ref, o_ref):
    # x_ref: (TILE_N, D) VMEM; w_ref: (1, D) VMEM (lane-dense, stays resident
    # across all batch tiles); b_ref: (1, 1) SMEM scalar; o_ref: (TILE_N, 1).
    z = jnp.sum(x_ref[...] * w_ref[...], axis=-1, keepdims=True) + b_ref[0, 0]
    # Exact sigmoid: kernel is HBM-bound, so the exact divide is free and
    # preserves tight tolerance vs. the reference (approx reciprocal would
    # only trade accuracy for an already-idle VALU slot).
    o_ref[...] = 1.0 / (1.0 + jnp.exp(-z))


def logreg_forward(x, w, bias, *, target_tile_bytes=2 * 1024 * 1024):
    """Forward pass of logreglayer as a batch-tiled Pallas kernel."""
    n, d = x.shape
    assert w.shape == (d, 1)

    x = x.astype(jnp.float32)
    wt = w.reshape(1, d).astype(jnp.float32)      # lane-dense weight layout
    b = bias.reshape(1, 1).astype(jnp.float32)    # scalar, kept in SMEM

    # Pick a batch tile of roughly `target_tile_bytes` of f32 x, capped at
    # 1024 rows, multiple of 8 (sublane), and never larger than the
    # (8-aligned) batch itself to avoid pointless padding for tiny inputs.
    rows = max(8, target_tile_bytes // (4 * d))
    tile_n = max(8, (min(rows, 1024) // 8) * 8)
    tile_n = min(tile_n, ((n + 7) // 8) * 8)

    # Pad the ragged batch tail; the extra rows are computed and sliced off.
    num_tiles = pl.cdiv(n, tile_n)
    n_pad = num_tiles * tile_n
    if n_pad != n:
        x = jnp.pad(x, ((0, n_pad - n), (0, 0)))

    out = pl.pallas_call(
        _logreg_kernel,
        out_shape=jax.ShapeDtypeStruct((n_pad, 1), jnp.float32),
        grid_spec=pltpu.PrefetchScalarGridSpec(
            num_scalar_prefetch=0,
            grid=(num_tiles,),
            in_specs=[
                pl.BlockSpec((tile_n, d), lambda i: (i, 0)),   # x tile
                pl.BlockSpec((1, d), lambda i: (0, 0)),        # w (resident)
                pl.BlockSpec(memory_space=pltpu.MemorySpace.SMEM),  # bias
            ],
            out_specs=pl.BlockSpec((tile_n, 1), lambda i: (i, 0)),
        ),
        compiler_params=pltpu.CompilerParams(
            dimension_semantics=("parallel",),   # shards across v7x's 2 TCs
        ),
    )(x, wt, b)
    return out[:n]


if __name__ == "__main__":
    # Deterministic parameter init mirroring the module's __init__:
    #   bias = zeros(1), w = randn(dims, 1)
    dims = 32
    key = jax.random.PRNGKey(0)
    kx1, kx2, kw = jax.random.split(key, 3)

    w = jax.random.normal(kw, (dims, 1), dtype=jnp.float32)
    bias = jnp.zeros((1,), dtype=jnp.float32)

    def _ref(x):
        return 1.0 / (1.0 + jnp.exp(-(x @ w + bias)))

    # Case 1: small, ragged batch (exercises the pad-and-slice tail path).
    x_small = jax.random.normal(kx1, (10, dims), dtype=jnp.float32)
    out_small = jax.block_until_ready(logreg_forward(x_small, w, bias))
    assert out_small.shape == (10, 1)
    assert jnp.allclose(out_small, _ref(x_small), atol=1e-5, rtol=1e-5)

    # Case 2: multi-tile batch (exercises the pipelined / parallel grid).
    x_big = jax.random.normal(kx2, (2048, dims), dtype=jnp.float32)
    out_big = jax.block_until_ready(logreg_forward(x_big, w, bias))
    assert out_big.shape == (2048, 1)
    assert jnp.allclose(out_big, _ref(x_big), atol=1e-5, rtol=1e-5)

    print("KERNEL_OK")
</pallas_src>

<mosaic_0001>
module attributes {stable_mosaic.version = 11 : i64} {
  func.func @_logreg_kernel(%arg0: i32, %arg1: memref<16x32xf32, #tpu.memory_space<vmem>>, %arg2: memref<1x32xf32, #tpu.memory_space<vmem>>, %arg3: memref<1x1xf32, #tpu.memory_space<smem>>, %arg4: memref<16x1xf32, #tpu.memory_space<vmem>>) attributes {dimension_semantics = [#tpu.dimension_semantics<parallel>], iteration_bounds = array<i64: 1>, scalar_prefetch = 0 : i64, scratch_operands = 0 : i64, tpu.core_type = #tpu.core_type<tc>, window_params = [{transform_indices = @transform_0, window_bounds = array<i64: 16, 32>}, {pipeline_mode = #tpu.pipeline_mode<synchronous>, transform_indices = @transform_1, window_bounds = array<i64: 1, 32>}, {transform_indices = @transform_2, window_bounds = array<i64: 1, 1>}, {transform_indices = @transform_3, window_bounds = array<i64: 16, 1>}]} {
    %c0 = arith.constant 0 : index
    %c0_0 = arith.constant 0 : index
    %0 = vector.load %arg1[%c0, %c0_0] : memref<16x32xf32, #tpu.memory_space<vmem>>, vector<16x32xf32>
    %c0_1 = arith.constant 0 : index
    %c0_2 = arith.constant 0 : index
    %1 = vector.load %arg2[%c0_1, %c0_2] : memref<1x32xf32, #tpu.memory_space<vmem>>, vector<1x32xf32>
    %2 = vector.broadcast %1 : vector<1x32xf32> to vector<16x32xf32>
    %3 = arith.mulf %0, %2 : vector<16x32xf32>
    %cst = arith.constant dense<0.000000e+00> : vector<16xf32>
    %4 = vector.multi_reduction <add>, %3, %cst [1] : vector<16x32xf32> to vector<16xf32>
    %5 = vector.shape_cast %4 : vector<16xf32> to vector<16x1xf32>
    %c0_3 = arith.constant 0 : index
    %c0_4 = arith.constant 0 : index
    %6 = memref.load %arg3[%c0_3, %c0_4] : memref<1x1xf32, #tpu.memory_space<smem>>
    %7 = vector.broadcast %6 : f32 to vector<16x1xf32>
    %8 = arith.addf %5, %7 : vector<16x1xf32>
    %cst_5 = arith.constant 0.000000e+00 : f32
    %9 = vector.broadcast %cst_5 : f32 to vector<16x1xf32>
    %10 = arith.subf %9, %8 : vector<16x1xf32>
    %11 = math.exp %10 : vector<16x1xf32>
    %cst_6 = arith.constant 1.000000e+00 : f32
    %12 = vector.broadcast %cst_6 : f32 to vector<16x1xf32>
    %13 = arith.addf %12, %11 : vector<16x1xf32>
    %cst_7 = arith.constant 1.000000e+00 : f32
    %14 = vector.broadcast %cst_7 : f32 to vector<16x1xf32>
    %15 = arith.divf %14, %13 : vector<16x1xf32>
    %c0_8 = arith.constant 0 : index
    %c0_9 = arith.constant 0 : index
    %16 = vector.load %arg4[%c0_8, %c0_9] : memref<16x1xf32, #tpu.memory_space<vmem>>, vector<16x1xf32>
    tpu.vector_store %arg4[%c0_8, %c0_9], %15 {strides = array<i32>} : memref<16x1xf32, #tpu.memory_space<vmem>>, vector<16x1xf32>,
    return
  }
  func.func @transform_0(%arg0: i32) -> (i32, i32) {
    %c0_i32 = arith.constant 0 : i32
    %c0_i32_0 = arith.constant 0 : i32
    return %arg0, %c0_i32 : i32, i32
  }
  func.func @transform_1(%arg0: i32) -> (i32, i32) {
    %c0_i32 = arith.constant 0 : i32
    %c0_i32_0 = arith.constant 0 : i32
    %c0_i32_1 = arith.constant 0 : i32
    return %c0_i32, %c0_i32_0 : i32, i32
  }
  func.func @transform_2(%arg0: i32) -> (i32, i32) {
    %c0_i32 = arith.constant 0 : i32
    %c0_i32_0 = arith.constant 0 : i32
    %c0_i32_1 = arith.constant 0 : i32
    return %c0_i32, %c0_i32_0 : i32, i32
  }
  func.func @transform_3(%arg0: i32) -> (i32, i32) {
    %c0_i32 = arith.constant 0 : i32
    %c0_i32_0 = arith.constant 0 : i32
    return %arg0, %c0_i32 : i32, i32
  }
}

</mosaic_0001>

<bundles_post_ra>
// kernel: tpu_custom_call.1
= control target key start
LH: loop header
LB: loop body
LE: loop exit
PB: predicated region body
PF: predicated region fallthrough
CT: control target
= control target key end

     0   :  { %9 = vsyncpa [#allocation4], 0  ;;  %s134_s15 = smov [#allocation3]   ;;  %s135_s17 = smov 128   ;;  %s174_s0 = inlined_call_operand.hbm [shape: f32[16,32], index: 0, kind: input, shape index: {}]   ;;  %s175_s1 = inlined_call_operand.vmem [shape: f32[1,32], index: 1, kind: input, shape index: {}]   ;;  %s176_s2 = inlined_call_operand.<no memory space> [shape: f32[1,1], index: 2, kind: input, shape index: {}]   ;;  %s177_s3 = inlined_call_operand.vmem [shape: f32[16,1], index: 3, kind: output, shape index: {}]  }
   0x1   :  { %s14_s14 = sshll.u32 %s174_s0, 4  ;;  %s16_s16 = sshll.u32 %s134_s15, 4  ;;  %s15_s14 = int_to_ptr.hbm [resolvable:$true] %s14_s14  ;;  %s17_s16 = int_to_ptr.vmem [resolvable:$true] %s16_s16 }
   0x2   :  { %s136_s18 = smov 8  }
   0x3   :  { %22 = dma.hbm_to_vmem [thread:$0]  %s15_s14, 256, %s17_s16, [#allocation4], %s135_s17, %s135_s17, %s136_s18  }
   0x4   :  { %132 = dma.done.wait [#allocation4], 256  }
   0x5   :  { %133 = vsyncadd [#allocation4], 4294967040  ;;  %v31_v0 = vld [vmem:[#allocation3] sm:$0xff]  ;;  %vm39_vm0 = vcmask 261120   ;;  %v32_v3 = vld [vmem:[#allocation3 + $0x8] sm:$0xff]  ;;  %v47_v7 = vstv %s176_s2  ;;  %vm88_vm3 = vcmask 7168  }
   0x6   :  { %v99_v1 = vld [vmem:[%s175_s1] ss:$0 sm:$0xff] }
   0x7   :  { %v37_v2 = vmul.f32 %v99_v1, %v31_v0  ;;  %v38_v5 = vmul.f32 %v99_v1, %v32_v3 }
   0x9   :  { %v40_v4 = vsel %vm39_vm0, %v37_v2, 0.0  ;;  %v43_v6 = vsel %vm39_vm0, %v38_v5, 0.0 }
   0xa   :  { %41 = vadd.xlane.f32.xlu0 %v40_v4 }
  0x12   :  { %44 = vadd.xlane.f32.xlu0 %v43_v6 }
  0x7d   :  { %v42_v8 = vpop.xlane.xlu0 %41 }
  0x7e   :  { %v48_v9 = vadd.f32 %v47_v7, %v42_v8 }
  0x80   :  { %v50_v10 = vsub.f32 0.0, %v48_v9 }
  0x82   :  { %v52_v11 = vmul.f32 1.442695, %v50_v10 }
  0x84   :  { %100 = vpow2.f32 %v52_v11 }
  0x85   :  { %v45_v12 = vpop.xlane.xlu0 %44 }
  0x86   :  { %v49_v13 = vadd.f32 %v47_v7, %v45_v12 }
  0x88   :  { %v51_v14 = vsub.f32 0.0, %v49_v13 }
  0x8a   :  { %v101_v15 = vpop.eup %100  ;;  %v54_v16 = vmul.f32 1.442695, %v51_v14 }
  0x8b   :  { %v56_v17 = vadd.f32 1.0, %v101_v15 }
  0x8c   :  { %102 = vpow2.f32 %v54_v16 }
  0x8d   :  { %104 = vrcp.f32 %v56_v17  ;;  %v69_v23 = vand.u32 2147483648, %v56_v17  ;;  %v67_v25 = vand.u32 2147483647, %v56_v17  ;;  %vm63_vm2 = vweird.f32 %v56_v17 }
  0x8f   :  { %v70_v28 = vor.u32 1.1754944e-38, %v69_v23  ;;  %vm68_vm5 = vcmp.eq.f32.partialorder %v67_v25, 8.507059e+37 }
  0x92   :  { %v103_v18 = vpop.eup %102 }
  0x93   :  { %v105_v19 = vpop.eup %104  ;;  %v57_v20 = vadd.f32 1.0, %v103_v18 }
  0x94   :  { %v59_v21 = vmul.f32 %v105_v19, %v56_v17  ;;  %vm64_vm1 = vweird.f32 %v105_v19 }
  0x95   :  { %106 = vrcp.f32 %v57_v20  ;;  %vm65_vm4 = vmor %vm63_vm2, %vm64_vm1  ;;  %v84_v33 = vand.u32 2147483648, %v57_v20  ;;  %v82_v35 = vand.u32 2147483647, %v57_v20  ;;  %vm78_vm7 = vweird.f32 %v57_v20 }
  0x96   :  { %v60_v22 = vsub.f32 1.0, %v59_v21 }
  0x97   :  { %v85_v37 = vor.u32 1.1754944e-38, %v84_v33  ;;  %vm83_vm9 = vcmp.eq.f32.partialorder %v82_v35, 8.507059e+37 }
  0x98   :  { %v61_v24 = vmul.f32 %v105_v19, %v60_v22 }
  0x9a   :  { %v62_v26 = vadd.f32 %v105_v19, %v61_v24 }
  0x9b   :  { %v107_v27 = vpop.eup %106 }
  0x9c   :  { %v66_v29 = vsel %vm65_vm4, %v105_v19, %v62_v26  ;;  %v74_v30 = vmul.f32 %v107_v27, %v57_v20  ;;  %vm79_vm6 = vweird.f32 %v107_v27 }
  0x9d   :  { %v71_v31 = vsel %vm68_vm5, %v70_v28, %v66_v29  ;;  %vm80_vm8 = vmor %vm78_vm7, %vm79_vm6 }
  0x9e   :  { %89 = vst.msk [vmem:[%s177_s3] sm:$0xff] %vm88_vm3, %v71_v31  ;;  %v75_v32 = vsub.f32 1.0, %v74_v30 }
  0xa0   :  { %v76_v34 = vmul.f32 %v107_v27, %v75_v32 }
  0xa2   :  { %v77_v36 = vadd.f32 %v107_v27, %v76_v34 }
  0xa4   :  { %v81_v38 = vsel %vm80_vm8, %v107_v27, %v77_v36 }
  0xa5   :  { %v86_v39 = vsel %vm83_vm9, %v85_v37, %v81_v38 }
  0xa6   :  { %90 = vst.msk [vmem:[%s177_s3 + $0x8] sm:$0xff] %vm88_vm3, %v86_v39 }
  0xa7   :  { %95 = vsyncpa [#allocation4], 1 }

</bundles_post_ra>
